<compile_context>
chip_gen: v5e
topology: v5e:2x2
jax: 0.10.0
libtpu: 0.0.40
codegen_flags: <defaults>
</compile_context>

<pallas_src>
import jax
import jax.numpy as jnp
from jax.experimental import pallas as pl
from jax.experimental.pallas import tpu as pltpu


# -----------------------------------------------------------------------------
# Pallas kernel: fused Linear -> ReLU -> Linear (per 128-row batch tile)
# -----------------------------------------------------------------------------
def _method_kernel(x_ref, w1_ref, b1_ref, w2_ref, b2_ref, o_ref):
    # h = relu(x @ W1 + b1): bf16 MXU matmul, f32 accumulation.
    h = jnp.dot(x_ref[...], w1_ref[...], preferred_element_type=jnp.float32)
    # Bias + ReLU in f32 on the VPU (v5e-safe; v6e/v7x also fine).
    h = jnp.maximum(h + b1_ref[...], 0.0)
    # y = h @ W2 + b2: re-narrow the activation to bf16 for the MXU.
    y = jnp.dot(h.astype(jnp.bfloat16), w2_ref[...],
                preferred_element_type=jnp.float32)
    y = y + b2_ref[...]
    o_ref[...] = y.astype(o_ref.dtype)


def _round_up(n: int, m: int) -> int:
    return ((n + m - 1) // m) * m


def _pad2(a, rows: int, cols: int):
    pr, pc = rows - a.shape[0], cols - a.shape[1]
    if pr or pc:
        a = jnp.pad(a, ((0, pr), (0, pc)))
    return a


def _mlp_method_pallas(x, w1, b1, w2, b2, *, block_b: int = 128):
    """Fused MLP forward, batch-tiled and lane-dense on TPU.

    Pads B up to a multiple of `block_b` and D/H/E up to multiples of 128
    (zero padding is exact: padded x columns are zero, padded W1 columns give
    relu(0+0)=0 hidden units, padded W2 rows contribute zero, and padded
    output rows/columns are sliced off).
    """
    B, D = x.shape
    H = w1.shape[1]
    E = w2.shape[1]
    Dp, Hp, Ep = _round_up(D, 128), _round_up(H, 128), _round_up(E, 128)
    Bp = _round_up(B, block_b)

    # bf16 operands for the MXU; biases stay f32 for the VPU epilogue.
    x_p = _pad2(x, Bp, Dp).astype(jnp.bfloat16)
    w1_p = _pad2(w1, Dp, Hp).astype(jnp.bfloat16)
    w2_p = _pad2(w2, Hp, Ep).astype(jnp.bfloat16)
    b1_p = _pad2(b1, 1, Hp).astype(jnp.float32)
    b2_p = _pad2(b2, 1, Ep).astype(jnp.float32)

    grid_b = Bp // block_b
    flops = 2 * Bp * (Dp * Hp + Hp * Ep)
    bytes_accessed = (
        x_p.size * 2 + w1_p.size * 2 + w2_p.size * 2
        + b1_p.size * 4 + b2_p.size * 4 + Bp * Ep * 4
    )

    out = pl.pallas_call(
        _method_kernel,
        out_shape=jax.ShapeDtypeStruct((Bp, Ep), jnp.float32),
        grid_spec=pltpu.PrefetchScalarGridSpec(
            num_scalar_prefetch=0,
            grid=(grid_b,),
            in_specs=[
                pl.BlockSpec((block_b, Dp), lambda i: (i, 0)),  # x tile
                pl.BlockSpec((Dp, Hp), lambda i: (0, 0)),       # W1 (resident)
                pl.BlockSpec((1, Hp), lambda i: (0, 0)),        # b1
                pl.BlockSpec((Hp, Ep), lambda i: (0, 0)),       # W2 (resident)
                pl.BlockSpec((1, Ep), lambda i: (0, 0)),        # b2
            ],
            out_specs=pl.BlockSpec((block_b, Ep), lambda i: (i, 0)),
        ),
        compiler_params=pltpu.CompilerParams(
            # Batch tiles are independent -> megacore sharding on v7x.
            dimension_semantics=("parallel",),
        ),
        cost_estimate=pl.CostEstimate(
            flops=flops, transcendentals=0, bytes_accessed=bytes_accessed
        ),
    )(x_p, w1_p, b1_p, w2_p, b2_p)

    # Slice off padded rows/columns before returning.
    return out[:B, :E].astype(x.dtype)


# -----------------------------------------------------------------------------
# Concrete "BaseMethod": a small MLP encoder whose forward is the Pallas kernel
# -----------------------------------------------------------------------------
class MLPMethod:
    """Representative wrapped method (stand-in for sslsv's abstract BaseMethod)."""

    def __init__(self, in_dim: int, hidden_dim: int, emb_dim: int, key):
        k1, k2 = jax.random.split(key)
        # f32 master weights; the kernel path narrows to bf16 for the MXU.
        self.w1 = (jax.random.normal(k1, (in_dim, hidden_dim), jnp.float32)
                   * (2.0 / in_dim) ** 0.5)
        self.b1 = jnp.zeros((1, hidden_dim), jnp.float32)
        self.w2 = (jax.random.normal(k2, (hidden_dim, emb_dim), jnp.float32)
                   * (2.0 / hidden_dim) ** 0.5)
        self.b2 = jnp.zeros((1, emb_dim), jnp.float32)

    def __call__(self, x, training: bool = False):
        # `training` has no effect on this purely-linear method (no dropout/BN);
        # kept for API parity with BaseMethod.forward(x, training).
        return _mlp_method_pallas(x, self.w1, self.b1, self.w2, self.b2)


class MethodWrapper:
    """JAX port of sslsv MethodWrapper: delegates forward to `self.module`."""

    def __init__(self, method):
        self.module = method

    def forward(self, x, training: bool = False):
        return self.module(x, training)

    __call__ = forward


# -----------------------------------------------------------------------------
# Reference (pure JAX) mirroring the kernel's bf16-matmul / f32-epilogue numerics
# -----------------------------------------------------------------------------
def _ref_forward(x, m: MLPMethod):
    h = jnp.dot(x.astype(jnp.bfloat16), m.w1.astype(jnp.bfloat16),
                preferred_element_type=jnp.float32) + m.b1
    h = jnp.maximum(h, 0.0)
    y = jnp.dot(h.astype(jnp.bfloat16), m.w2.astype(jnp.bfloat16),
                preferred_element_type=jnp.float32) + m.b2
    return y


if __name__ == "__main__":
    key = jax.random.PRNGKey(0)
    k_x, k_m, k_x2, k_m2 = jax.random.split(key, 4)

    # ---- Lane-dense, batch-tiled case (the perf-relevant path) -------------
    # All dims multiples of 128, 2 grid steps -> unmasked stores, full vregs,
    # bf16 MXU, and something for v7x megacore to split.
    B, D, H, E = 256, 128, 256, 128
    x = jax.random.normal(k_x, (B, D), jnp.float32)
    method = MLPMethod(D, H, E, k_m)
    wrapper = MethodWrapper(method)

    out = jax.block_until_ready(wrapper(x, training=False))
    ref = _ref_forward(x, method)
    assert out.shape == (B, E)
    assert jnp.allclose(out, ref, atol=2e-2, rtol=2e-2)

    # ---- Small, non-128 shapes: exercises the zero-padding path ------------
    B2, D2, H2, E2 = 8, 32, 64, 32
    x2 = jax.random.normal(k_x2, (B2, D2), jnp.float32)
    method2 = MLPMethod(D2, H2, E2, k_m2)
    out2 = jax.block_until_ready(MethodWrapper(method2)(x2, training=False))
    ref2 = _ref_forward(x2, method2)
    assert out2.shape == (B2, E2)
    assert jnp.allclose(out2, ref2, atol=2e-2, rtol=2e-2)

    print("KERNEL_OK")
</pallas_src>

<mosaic_0001>
module attributes {stable_mosaic.version = 11 : i64} {
  func.func @_method_kernel(%arg0: i32, %arg1: memref<128x128xbf16, #tpu.memory_space<vmem>>, %arg2: memref<128x256xbf16, #tpu.memory_space<vmem>>, %arg3: memref<1x256xf32, #tpu.memory_space<vmem>>, %arg4: memref<256x128xbf16, #tpu.memory_space<vmem>>, %arg5: memref<1x128xf32, #tpu.memory_space<vmem>>, %arg6: memref<128x128xf32, #tpu.memory_space<vmem>>) attributes {dimension_semantics = [#tpu.dimension_semantics<parallel>], iteration_bounds = array<i64: 2>, scalar_prefetch = 0 : i64, scratch_operands = 0 : i64, tpu.core_type = #tpu.core_type<tc>, window_params = [{transform_indices = @transform_0, window_bounds = array<i64: 128, 128>}, {pipeline_mode = #tpu.pipeline_mode<synchronous>, transform_indices = @transform_1, window_bounds = array<i64: 128, 256>}, {pipeline_mode = #tpu.pipeline_mode<synchronous>, transform_indices = @transform_2, window_bounds = array<i64: 1, 256>}, {pipeline_mode = #tpu.pipeline_mode<synchronous>, transform_indices = @transform_3, window_bounds = array<i64: 256, 128>}, {pipeline_mode = #tpu.pipeline_mode<synchronous>, transform_indices = @transform_4, window_bounds = array<i64: 1, 128>}, {transform_indices = @transform_5, window_bounds = array<i64: 128, 128>}]} {
    %c0 = arith.constant 0 : index
    %c0_0 = arith.constant 0 : index
    %0 = vector.load %arg1[%c0, %c0_0] : memref<128x128xbf16, #tpu.memory_space<vmem>>, vector<128x128xbf16>
    %c0_1 = arith.constant 0 : index
    %c0_2 = arith.constant 0 : index
    %1 = vector.load %arg2[%c0_1, %c0_2] : memref<128x256xbf16, #tpu.memory_space<vmem>>, vector<128x256xbf16>
    %cst = arith.constant dense<0.000000e+00> : vector<128x256xf32>
    %2 = tpu.matmul %0, %1, %cst {dimension_numbers = #tpu.dot_dimension_numbers<[1], [0], [0], [1], [0, 0, 1, 1], [], []>} : vector<128x128xbf16>, vector<128x256xbf16>, vector<128x256xf32> -> vector<128x256xf32>
    %c0_3 = arith.constant 0 : index
    %c0_4 = arith.constant 0 : index
    %3 = vector.load %arg3[%c0_3, %c0_4] : memref<1x256xf32, #tpu.memory_space<vmem>>, vector<1x256xf32>
    %4 = vector.broadcast %3 : vector<1x256xf32> to vector<128x256xf32>
    %5 = arith.addf %2, %4 : vector<128x256xf32>
    %cst_5 = arith.constant 0.000000e+00 : f32
    %6 = vector.broadcast %cst_5 : f32 to vector<128x256xf32>
    %7 = arith.maximumf %5, %6 : vector<128x256xf32>
    %8 = arith.truncf %7 : vector<128x256xf32> to vector<128x256xbf16>
    %c0_6 = arith.constant 0 : index
    %c0_7 = arith.constant 0 : index
    %9 = vector.load %arg4[%c0_6, %c0_7] : memref<256x128xbf16, #tpu.memory_space<vmem>>, vector<256x128xbf16>
    %cst_8 = arith.constant dense<0.000000e+00> : vector<128x128xf32>
    %10 = tpu.matmul %8, %9, %cst_8 {dimension_numbers = #tpu.dot_dimension_numbers<[1], [0], [0], [1], [0, 0, 1, 1], [], []>} : vector<128x256xbf16>, vector<256x128xbf16>, vector<128x128xf32> -> vector<128x128xf32>
    %c0_9 = arith.constant 0 : index
    %c0_10 = arith.constant 0 : index
    %11 = vector.load %arg5[%c0_9, %c0_10] : memref<1x128xf32, #tpu.memory_space<vmem>>, vector<1x128xf32>
    %12 = vector.broadcast %11 : vector<1x128xf32> to vector<128x128xf32>
    %13 = arith.addf %10, %12 : vector<128x128xf32>
    %c0_11 = arith.constant 0 : index
    %c0_12 = arith.constant 0 : index
    %14 = vector.load %arg6[%c0_11, %c0_12] : memref<128x128xf32, #tpu.memory_space<vmem>>, vector<128x128xf32>
    tpu.vector_store %arg6[%c0_11, %c0_12], %13 {strides = array<i32>} : memref<128x128xf32, #tpu.memory_space<vmem>>, vector<128x128xf32>,
    return
  }
  func.func @transform_0(%arg0: i32) -> (i32, i32) {
    %c0_i32 = arith.constant 0 : i32
    %c0_i32_0 = arith.constant 0 : i32
    return %arg0, %c0_i32 : i32, i32
  }
  func.func @transform_1(%arg0: i32) -> (i32, i32) {
    %c0_i32 = arith.constant 0 : i32
    %c0_i32_0 = arith.constant 0 : i32
    %c0_i32_1 = arith.constant 0 : i32
    return %c0_i32, %c0_i32_0 : i32, i32
  }
  func.func @transform_2(%arg0: i32) -> (i32, i32) {
    %c0_i32 = arith.constant 0 : i32
    %c0_i32_0 = arith.constant 0 : i32
    %c0_i32_1 = arith.constant 0 : i32
    return %c0_i32, %c0_i32_0 : i32, i32
  }
  func.func @transform_3(%arg0: i32) -> (i32, i32) {
    %c0_i32 = arith.constant 0 : i32
    %c0_i32_0 = arith.constant 0 : i32
    %c0_i32_1 = arith.constant 0 : i32
    return %c0_i32, %c0_i32_0 : i32, i32
  }
  func.func @transform_4(%arg0: i32) -> (i32, i32) {
    %c0_i32 = arith.constant 0 : i32
    %c0_i32_0 = arith.constant 0 : i32
    %c0_i32_1 = arith.constant 0 : i32
    return %c0_i32, %c0_i32_0 : i32, i32
  }
  func.func @transform_5(%arg0: i32) -> (i32, i32) {
    %c0_i32 = arith.constant 0 : i32
    %c0_i32_0 = arith.constant 0 : i32
    return %arg0, %c0_i32 : i32, i32
  }
}

</mosaic_0001>

<bundles_post_ra>
// kernel: tpu_custom_call.1
= control target key start
LH: loop header
LB: loop body
LE: loop exit
PB: predicated region body
PF: predicated region fallthrough
CT: control target
= control target key end

     0   :  { %10 = vsyncpa [#allocation3], 0  ;;  %s1763_s0 = inlined_call_operand.hbm [shape: bf16[256,128], index: 0, kind: input, shape index: {}]   ;;  %s1764_s1 = inlined_call_operand.hbm [shape: bf16[128,256], index: 1, kind: input, shape index: {}]   ;;  %s1765_s2 = inlined_call_operand.hbm [shape: f32[1,256], index: 2, kind: input, shape index: {}]   ;;  %s1766_s3 = inlined_call_operand.hbm [shape: bf16[256,128], index: 3, kind: input, shape index: {}]   ;;  %s1767_s4 = inlined_call_operand.vmem [shape: f32[1,128], index: 4, kind: input, shape index: {}]   ;;  %s1768_s5 = inlined_call_operand.hbm [shape: f32[256,128], index: 5, kind: output, shape index: {}]  }
   0x1   :  { %12 = vsyncpa [#allocation3 + $0x1], 0 }
   0x2   :  { %13 = vsyncpa [#allocation6], 0 }
   0x3   :  { %14 = vsyncpa [#allocation9], 0 }
   0x4   :  { %15 = vsyncpa [#allocation4], 0 }
   0x5   :  { %17 = vsyncpa [#allocation4 + $0x1], 0  ;;  %s1512_s18 = smov 0   ;;  %s1514_s19 = smov 0  }
   0x6   :  { %s1516_s20 = smov 0   ;;  %s1518_s21 = smov 0  }
   0x7 LB: > { %s1533_s22 = sadd.s32 4294967295, %s1471_s21   ;;  %s971_s23 = sadd.s32 4294967294, %s1471_s21   ;;  %s1471_s21 = sphi %s1518_s21, %s1781_s21   ;;  %s1467_s20 = sphi %s1516_s20, %s1780_s20   ;;  %s1463_s19 = sphi %s1514_s19, %s1779_s19   ;;  %s1459_s18 = sphi %s1512_s18, %s1778_s18  }
   0x8   : > { %p43_p0 = scmp.ne.s32.totalorder %s1463_s19, %s1459_s18  ;;  %p44_p1 = scmp.eq.s32.totalorder %s1533_s22, 0 }
   0x9   : > { %p151_p2 = scmp.eq.s32.totalorder %s1533_s22, 1  ;;  %p157_p3 = scmp.eq.s32.totalorder %s971_s23, 1 }
   0xa   : > { %p1542_p4 = por %p44_p1, %p43_p0  ;;  %p972_p5 = scmp.ge.s32.totalorder %s1471_s21, 1 }
   0xb   : > { %p1547_p6 = por %p157_p3, %p43_p0  ;;  %p164_p7 = scmp.lt.s32.totalorder %s1471_s21, 3 }
   0xc   : > { %s175_s28 = sshll.u32 %s1764_s1, 4  ;;  %s1473_s30 = smov [#allocation5]   ;;  %s176_s28 = int_to_ptr.hbm [resolvable:$true] %s175_s28 }
   0xd   : > { %p1555_p8 = pnand %p972_p5, %p164_p7  ;;  %s177_s6 = sshll.u32 %s1473_s30, 4  ;;  %s178_s6 = int_to_ptr.vmem [resolvable:$true] %s177_s6 }
   0xe   : > { %s190_s10 = sshll.u32 %s1765_s2, 4  ;;  %s1474_s11 = smov 128   ;;  %s191_s10 = int_to_ptr.hbm [resolvable:$true] %s190_s10 }
   0xf   : > { %p1209_p9 = pneg %p1555_p8  ;;  %s1475_s12 = smov 8  }
  0x10   : > { %s1476_s13 = smov [#allocation7]   ;;  %s201_s17 = sshll.u32 %s1766_s3, 4  ;;  %s202_s17 = int_to_ptr.hbm [resolvable:$true] %s201_s17 }
  0x11   : > { %p1563_p10 = pnand %p1209_p9, %p44_p1  ;;  %s192_s14 = sshll.u32 %s1476_s13, 4  ;;  %s193_s14 = int_to_ptr.vmem [resolvable:$true] %s192_s14 }
  0x12   : > { %s1477_s23 = smov [#allocation8]   ;;  %s1769_s27 = smov 64  }
  0x13   : > { %1212 = dma.hbm_to_vmem [thread:$0]  (!%p1563_p10), %s176_s28, 2048, %s178_s6, [#allocation6], %s1474_s11, %s1474_s11, %s1475_s12  }
  0x14   : > { %1215 = dma.hbm_to_vmem [thread:$0]  (!%p1563_p10), %s191_s10, 32, %s193_s14, [#allocation6]  }
  0x15   : > { %s203_s26 = sshll.u32 %s1477_s23, 4  ;;  %s1479_s28 = smov 4   ;;  %s204_s26 = int_to_ptr.vmem [resolvable:$true] %s203_s26 }
  0x16   : > { %1218 = dma.hbm_to_vmem [thread:$0]  (!%p1563_p10), %s202_s17, 2048, %s204_s26, [#allocation9], %s1769_s27, %s1769_s27, %s1479_s28  }
  0x17   : > { %s1584_s30 = sadd.s32 1, %s1471_s21   ;;  %s30_s8 = sadd.s32 1, %s1467_s20 }
  0x18   : > { %s27_s6 = ssub.s32 %s1471_s21, %s1584_s30  ;;  %p37_p13 = scmp.ne.s32.totalorder %s1467_s20, %s1463_s19 }
  0x19   : > { %p28_p12 = scmp.eq.s32.totalorder %s27_s6, 0  ;;  %p38_p0 = scmp.eq.s32.totalorder %s1471_s21, 0 }
  0x1a   : > { %p1597_p3 = por %p151_p2, %p37_p13  ;;  %p1230_p5 = scmp.lt.s32.totalorder %s1471_s21, 2 }
  0x1b   : > { %s1593_s9 = scalar_select %p28_p12, %s1467_s20, %s30_s8  }
  0x1c   : > { %s220_s7 = sand.u32 1, %s1467_s20   ;;  %s1151_s11 = sshll.u32 %s1471_s21, 6 }
  0x1d   : > { %p39_p7 = por %p38_p0, %p37_p13  ;;  %s977_s12 = sshll.u32 %s220_s7, 6 }
  0x1e   : > { %s229_s15 = scalar_lea.hbm %s1763_s0, %s1151_s11  ;;  %s224_s17 = scalar_lea.vmem [#allocation2], %s977_s12 }
  0x1f   : > { %s230_s16 = sshll.u32 %s229_s15, 4  ;;  %s232_s23 = sshll.u32 %s224_s17, 4  ;;  %s231_s16 = int_to_ptr.hbm [resolvable:$true] %s230_s16  ;;  %s233_s23 = int_to_ptr.vmem [resolvable:$true] %s232_s23 }
  0x20   : > { %p1607_p9 = pnand %p1230_p5, %p39_p7  ;;  %s221_s6 = scalar_lea.sflag [#allocation3], %s220_s7 }
  0x21   : > { %s1367_s8 = sshra.s32 %s231_s16, 4  ;;  %s1374_s12 = scalar_lea.hbm %s1763_s0, 128  ;;  %s1368_s8 = int_to_ptr.hbm [resolvable:$true] %s1367_s8 }
  0x22   : > { %s1369_s27 = scalar_lea.hbm %s1368_s8, 64  ;;  %p1371_p10 = pneg %p1607_p9 }
  0x23   : > { %p1370_p2 = scmp.ne.s32.totalorder %s1368_s8, %s1369_s27  ;;  %p1375_p0 = scmp.lt.s32.totalorder %s1368_s8, %s1763_s0 }
  0x24   : > { %p1376_p5 = scmp.lt.s32.totalorder %s1374_s12, %s1369_s27 }
  0x25   : > { %p1372_p12 = pnand %p1371_p10, %p1370_p2 }
  0x26   : > { %p1377_p7 = por %p1376_p5, %p1375_p0 }
  0x27   : > { %p1373_p13 = pneg %p1372_p12 }
  0x29   : > { %p1378_p11 = pnand %p1377_p7, %p1373_p13 }
  0x2b   : > { %1381 = shalt.err (!%p1378_p11)
}
  0x2c   : > { %s1776_s7 = smov 64   ;;  %244 = sbr.rel (%p1555_p8) target bundleno = 488 (0x1e8), region = 40 }
  0x2d   : > { %1222 = dma.hbm_to_vmem [thread:$0]  (!%p1607_p9), %s231_s16, 1024, %s233_s23, %s221_s6, %s1776_s7, %s1776_s7, %s1479_s28  }
  0x2e   : > { %s1627_s17 = sand.u32 (!%p1555_p8), 1, %s1463_s19  }
  0x2f   : > { %s981_s8 = sshll.u32 (!%p1555_p8), %s1627_s17, 6  ;;  %s247_s27 = scalar_lea.sflag (!%p1555_p8), [#allocation3], %s1627_s17 }
  0x30   : > { %s1631_s11 = scalar_lea.vmem (!%p1555_p8), [#allocation2], %s981_s8 }
  0x31   : > { %1442 = dma.done.wait (%p1542_p4), %s247_s27, 1024  }
  0x32   : > { %1444 = vsyncadd (%p1542_p4), %s247_s27, 4294966272 }
  0x33   : > { %1446 = dma.done.wait (%p44_p1), [#allocation6], 2080  }
  0x34   : > { %1448 = vsyncadd (%p44_p1), [#allocation6], 4294965216 }
  0x35   : > { %1450 = dma.done.wait (%p44_p1), [#allocation9], 2048  }
  0x36   : > { %1452 = vsyncadd (%p44_p1), [#allocation9], 4294965248  ;;  %v1076_v0 = vld [vmem:[#allocation5 + $0x70] sm:$0xf]  ;;  %v1175_v1 = vld [vmem:[#allocation5 + $0x74] sm:$0xf0] }
  0x37   : > { %v1174_v2 = vld [vmem:[#allocation5 + $0x74] sm:$0xf]  ;;  %v1077_v3 = vor.u32 %v1175_v1, %v1076_v0  ;;  %v1078_v4 = vld [vmem:[#allocation5 + $0x78] sm:$0xf0]  ;;  %v1068_v5 = vld [vmem:[#allocation5 + $0x60] sm:$0xf] }
  0x38   : > { %v1173_v6 = vld [vmem:[#allocation5 + $0x64] sm:$0xf0]  ;;  %v1081_v7 = vor.u32 %v1174_v2, %v1078_v4  ;;  %v1172_v8 = vld [vmem:[#allocation5 + $0x64] sm:$0xf]  ;;  %v1070_v9 = vld [vmem:[#allocation5 + $0x68] sm:$0xf0] }
  0x39   : > { %461 = vmatpush.bf16.msra.mxu0 %v1077_v3  ;;  %v1069_v10 = vor.u32 %v1173_v6, %v1068_v5  ;;  %v1073_v11 = vor.u32 %v1172_v8, %v1070_v9  ;;  %v1060_v12 = vld [vmem:[#allocation5 + $0x50] sm:$0xf]  ;;  %v1171_v13 = vld [vmem:[#allocation5 + $0x54] sm:$0xf0]  ;;  %v1170_v14 = vld [vmem:[#allocation5 + $0x54] sm:$0xf] }
  0x3a   : > { %510 = vmatpush.bf16.msra.mxu1 %v1081_v7  ;;  %v1062_v15 = vld [vmem:[#allocation5 + $0x58] sm:$0xf0]  ;;  %v1061_v16 = vor.u32 %v1171_v13, %v1060_v12  ;;  %v1052_v18 = vld [vmem:[#allocation5 + $0x40] sm:$0xf]  ;;  %v1169_v19 = vld [vmem:[#allocation5 + $0x44] sm:$0xf0] }
  0x3b   : > { %v1065_v17 = vor.u32 %v1170_v14, %v1062_v15  ;;  %v1168_v20 = vld [vmem:[#allocation5 + $0x44] sm:$0xf]  ;;  %v1054_v21 = vld [vmem:[#allocation5 + $0x48] sm:$0xf0]  ;;  %v1053_v22 = vor.u32 %v1169_v19, %v1052_v18  ;;  %v1044_v24 = vld [vmem:[#allocation5 + $0x30] sm:$0xf] }
  0x3c   : > { %v1057_v23 = vor.u32 %v1168_v20, %v1054_v21  ;;  %v1167_v25 = vld [vmem:[#allocation5 + $0x34] sm:$0xf0]  ;;  %v1166_v26 = vld [vmem:[#allocation5 + $0x34] sm:$0xf]  ;;  %v1046_v27 = vld [vmem:[#allocation5 + $0x38] sm:$0xf0] }
  0x3d   : > { %462 = vmatpush.bf16.msra.mxu0 %v1069_v10  ;;  %v1045_v28 = vor.u32 %v1167_v25, %v1044_v24  ;;  %v1049_v29 = vor.u32 %v1166_v26, %v1046_v27  ;;  %v1036_v30 = vld [vmem:[#allocation5 + $0x20] sm:$0xf]  ;;  %v1165_v31 = vld [vmem:[#allocation5 + $0x24] sm:$0xf0]  ;;  %v1164_v32 = vld [vmem:[#allocation5 + $0x24] sm:$0xf] }
  0x3e   : > { %511 = vmatpush.bf16.msra.mxu1 %v1073_v11  ;;  %v1038_v33 = vld [vmem:[#allocation5 + $0x28] sm:$0xf0]  ;;  %v1037_v34 = vor.u32 %v1165_v31, %v1036_v30  ;;  %v1028_v36 = vld [vmem:[#allocation5 + $0x10] sm:$0xf]  ;;  %v1163_v37 = vld [vmem:[#allocation5 + $0x14] sm:$0xf0] }
  0x3f   : > { %v1041_v35 = vor.u32 %v1164_v32, %v1038_v33  ;;  %v1162_v38 = vld [vmem:[#allocation5 + $0x14] sm:$0xf]  ;;  %v1030_v39 = vld [vmem:[#allocation5 + $0x18] sm:$0xf0]  ;;  %v1029_v40 = vor.u32 %v1163_v37, %v1028_v36  ;;  %v1020_v42 = vld [vmem:[#allocation5] sm:$0xf] }
  0x40   : > { %v1033_v41 = vor.u32 %v1162_v38, %v1030_v39  ;;  %v1161_v43 = vld [vmem:[#allocation5 + $0x4] sm:$0xf0]  ;;  %v1160_v44 = vld [vmem:[#allocation5 + $0x4] sm:$0xf]  ;;  %v1022_v45 = vld [vmem:[#allocation5 + $0x8] sm:$0xf0] }
  0x41   : > { %463 = vmatpush.bf16.msra.mxu0 %v1061_v16  ;;  %v1021_v46 = vor.u32 %v1161_v43, %v1020_v42  ;;  %v1025_v47 = vor.u32 %v1160_v44, %v1022_v45  ;;  %v1152_v48 = vld [vmem:[%s1631_s11] sm:$0xff]  ;;  %v1153_v49 = vld [vmem:[%s1631_s11 + $0x8] sm:$0xff]  ;;  %v1154_v50 = vld [vmem:[%s1631_s11 + $0x10] sm:$0xff]  ;;  %s985_s28 = sshll.u32 %s1627_s17, 7  ;;  %s1192_s23 = sshll.u32 %s1533_s22, 7 }
  0x42   : > { %512 = vmatpush.bf16.msra.mxu1 %v1065_v17  ;;  %v1155_v51 = vld [vmem:[%s1631_s11 + $0x18] sm:$0xff]  ;;  %v1156_v52 = vld [vmem:[%s1631_s11 + $0x20] sm:$0xff]  ;;  %v1157_v55 = vld [vmem:[%s1631_s11 + $0x28] sm:$0xff]  ;;  %s1696_s16 = scalar_lea.vmem [#allocation10], %s985_s28  ;;  %s865_s13 = scalar_lea.hbm %s1768_s5, %s1192_s23 }
  0x43   : > { %v1183_v53 = vld [vmem:[#allocation8 + $0x38] sm:$0xff]  ;;  %v1182_v56 = vld [vmem:[#allocation8 + $0x30] sm:$0xff]  ;;  %v1181_v58 = vld [vmem:[#allocation8 + $0x28] sm:$0xff]  ;;  %s866_s12 = sshll.u32 %s1696_s16, 4  ;;  %s868_s14 = sshll.u32 %s865_s13, 4  ;;  %s867_s12 = int_to_ptr.vmem [resolvable:$true] %s866_s12  ;;  %s869_s14 = int_to_ptr.hbm [resolvable:$true] %s868_s14 }
  0x44   : > { %v1191_v54 = vld [vmem:[#allocation8 + $0x78] sm:$0xff]  ;;  %739 = vmatpush.bf16.msra.mxu2 %v1183_v53  ;;  %v1190_v57 = vld [vmem:[#allocation8 + $0x70] sm:$0xff]  ;;  %v1189_v59 = vld [vmem:[#allocation8 + $0x68] sm:$0xff]  ;;  %s854_s15 = scalar_lea.sflag [#allocation4], %s1627_s17  ;;  %s1411_s7 = sshra.s32 %s869_s14, 4  ;;  %s1412_s7 = int_to_ptr.hbm [resolvable:$true] %s1411_s7 }
  0x45   : > { %464 = vmatpush.bf16.msra.mxu0 %v1053_v22  ;;  %788 = vmatpush.bf16.msra.mxu3 %v1191_v54  ;;  %v1180_v60 = vld [vmem:[#allocation8 + $0x20] sm:$0xff]  ;;  %v1158_v62 = vld [vmem:[%s1631_s11 + $0x30] sm:$0xff]  ;;  %v1179_v63 = vld [vmem:[#allocation8 + $0x18] sm:$0xff]  ;;  %s1413_s22 = scalar_lea.hbm %s1412_s7, 128  ;;  %p1418_p11 = scmp.lt.s32.totalorder %s1412_s7, %s1768_s5 }
  0x46   : > { %513 = vmatpush.bf16.msra.mxu1 %v1057_v23  ;;  %v1188_v61 = vld [vmem:[#allocation8 + $0x60] sm:$0xff]  ;;  %v1187_v0 = vld [vmem:[#allocation8 + $0x58] sm:$0xff]  ;;  %v1178_v1 = vld [vmem:[#allocation8 + $0x10] sm:$0xff]  ;;  %p1414_p1 = scmp.ne.s32.totalorder %s1412_s7, %s1413_s22 }
  0x47   : > { %v1186_v2 = vld [vmem:[#allocation8 + $0x50] sm:$0xff]  ;;  %v1177_v3 = vld [vmem:[#allocation8 + $0x8] sm:$0xff]  ;;  %v1176_v5 = vld [vmem:[#allocation8] sm:$0xff] }
  0x48   : > { %740 = vmatpush.bf16.msra.mxu2 %v1182_v56  ;;  %v1185_v4 = vld [vmem:[#allocation8 + $0x48] sm:$0xff]  ;;  %v1184_v6 = vld [vmem:[#allocation8 + $0x40] sm:$0xff]  ;;  %v1159_v7 = vld [vmem:[%s1631_s11 + $0x38] sm:$0xff]  ;;  %p1415_p4 = pnand %p1414_p1, %p1597_p3  ;;  %s1417_s11 = scalar_lea.hbm %s1768_s5, 256 }
  0x49   : > { %465 = vmatpush.bf16.msra.mxu0 %v1045_v28  ;;  %789 = vmatpush.bf16.msra.mxu3 %v1190_v57  ;;  %v327_v8 = vld [vmem:[#allocation7] sm:$0x3]  ;;  %p1419_p9 = scmp.lt.s32.totalorder %s1417_s11, %s1413_s22 }
  0x4a   : > { %514 = vmatpush.bf16.msra.mxu1 %v1049_v29  ;;  %v1653_v11 = vperm.slane %v327_v8, 0  ;;  %v1655_v12 = vperm.slane %v327_v8, 1  ;;  %p1416_p8 = pneg %p1415_p4 }
  0x4b   : > { %p1420_p2 = por %p1419_p9, %p1418_p11 }
  0x4c   : > { %741 = vmatpush.bf16.msra.mxu2 %v1181_v58 }
  0x4d   : > { %466 = vmatpush.bf16.msra.mxu0 %v1037_v34  ;;  %790 = vmatpush.bf16.msra.mxu3 %v1189_v59  ;;  %p1421_p10 = pnand %p1420_p2, %p1416_p8 }
  0x4e   : > { %515 = vmatpush.bf16.msra.mxu1 %v1041_v35 }
  0x50   : > { %742 = vmatpush.bf16.msra.mxu2 %v1180_v60 }
  0x51   : > { %467 = vmatpush.bf16.msra.mxu0 %v1029_v40  ;;  %791 = vmatpush.bf16.msra.mxu3 %v1188_v61 }
  0x52   : > { %516 = vmatpush.bf16.msra.mxu1 %v1033_v41 }
  0x54   : > { %743 = vmatpush.bf16.msra.mxu2 %v1179_v63 }
  0x55   : > { %468 = vmatpush.bf16.msra.mxu0 %v1021_v46  ;;  %792 = vmatpush.bf16.msra.mxu3 %v1187_v0 }
  0x56   : > { %517 = vmatpush.bf16.msra.mxu1 %v1025_v47 }
  0x58   : > { %469 = vmatmul.bf16.vlgmr.msra.gmra.mxu0 %v1152_v48  ;;  %744 = vmatpush.bf16.msra.mxu2 %v1178_v1 }
  0x59   : > { %518 = vmatmul.bf16.vlgmr.msra.gmra.mxu1 %v1152_v48  ;;  %793 = vmatpush.bf16.msra.mxu3 %v1186_v2 }
  0x5c   : > { %745 = vmatpush.bf16.msra.mxu2 %v1177_v3 }
  0x5d   : > { %794 = vmatpush.bf16.msra.mxu3 %v1185_v4 }
  0x60   : > { %746 = vmatpush.bf16.msra.mxu2 %v1176_v5 }
  0x61   : > { %795 = vmatpush.bf16.msra.mxu3 %v1184_v6 }
  0x68   : > { %474 = vmatmul.bf16.gmra.mxu0 %v1153_v49 }
  0x69   : > { %523 = vmatmul.bf16.gmra.mxu1 %v1153_v49 }
  0x78   : > { %479 = vmatmul.bf16.gmra.mxu0 %v1154_v50 }
  0x79   : > { %528 = vmatmul.bf16.gmra.mxu1 %v1154_v50 }
  0x88   : > { %484 = vmatmul.bf16.gmra.mxu0 %v1155_v51 }
  0x89   : > { %533 = vmatmul.bf16.gmra.mxu1 %v1155_v51 }
  0x98   : > { %489 = vmatmul.bf16.gmra.mxu0 %v1156_v52 }
  0x99   : > { %538 = vmatmul.bf16.gmra.mxu1 %v1156_v52 }
  0xa8   : > { %494 = vmatmul.bf16.gmra.mxu0 %v1157_v55 }
  0xa9   : > { %543 = vmatmul.bf16.gmra.mxu1 %v1157_v55 }
  0xb8   : > { %499 = vmatmul.bf16.gmra.mxu0 %v1158_v62 }
  0xb9   : > { %548 = vmatmul.bf16.gmra.mxu1 %v1158_v62 }
  0xc8   : > { %504 = vmatmul.bf16.gmra.mxu0 %v1159_v7 }
  0xc9   : > { %553 = vmatmul.bf16.gmra.mxu1 %v1159_v7 }
  0xd5   : > { %v470_v9 = vpop.f32.mrf.mxu0 }
  0xd6   : > { %v519_v10 = vpop.f32.mrf.mxu1  ;;  %v471_v13 = vadd.f32 %v470_v9, %v1653_v11 }
  0xd7   : > { %v520_v14 = vadd.f32 %v519_v10, %v1655_v12 }
  0xd8   : > { %v559_v19 = vmax.f32 %v471_v13, 0.0 }
  0xd9   : > { %v560_v21 = vmax.f32 %v520_v14, 0.0 }
  0xdd   : > { %v472_v15 = vpop.f32.mrf.mxu0 }
  0xde   : > { %v473_v16 = vadd.f32 %v472_v15, %v1653_v11  ;;  %v521_v17 = vpop.f32.mrf.mxu1 }
  0xdf   : > { %v522_v18 = vadd.f32 %v521_v17, %v1655_v12 }
  0xe0   : > { %v561_v20 = vmax.f32 %v473_v16, 0.0 }
  0xe1   : > { %v562_v22 = vmax.f32 %v522_v18, 0.0 }
  0xe2   : > { %v591_v23 = vpack.c.bf16 %v561_v20, %v559_v19 }
  0xe3   : > { %v592_v24 = vpack.c.bf16 %v562_v22, %v560_v21 }
  0xe4   : > { %747 = vmatmul.bf16.vlgmr.msra.gmra.mxu2 %v591_v23 }
  0xe5   : > { %796 = vmatmul.bf16.vlgmr.msra.gmra.mxu3 %v592_v24  ;;  %v475_v25 = vpop.f32.mrf.mxu0 }
  0xe6   : > { %v524_v26 = vpop.f32.mrf.mxu1  ;;  %v476_v27 = vadd.f32 %v475_v25, %v1653_v11 }
  0xe7   : > { %v525_v28 = vadd.f32 %v524_v26, %v1655_v12 }
  0xe8   : > { %v563_v33 = vmax.f32 %v476_v27, 0.0 }
  0xe9   : > { %v564_v35 = vmax.f32 %v525_v28, 0.0 }
  0xed   : > { %v477_v29 = vpop.f32.mrf.mxu0 }
  0xee   : > { %v478_v30 = vadd.f32 %v477_v29, %v1653_v11  ;;  %v526_v31 = vpop.f32.mrf.mxu1 }
  0xef   : > { %v527_v32 = vadd.f32 %v526_v31, %v1655_v12 }
  0xf0   : > { %v565_v34 = vmax.f32 %v478_v30, 0.0 }
  0xf1   : > { %v566_v36 = vmax.f32 %v527_v32, 0.0 }
  0xf2   : > { %v593_v37 = vpack.c.bf16 %v565_v34, %v563_v33 }
  0xf3   : > { %v594_v38 = vpack.c.bf16 %v566_v36, %v564_v35 }
  0xf4   : > { %752 = vmatmul.bf16.gmra.mxu2 %v593_v37 }
  0xf5   : > { %801 = vmatmul.bf16.gmra.mxu3 %v594_v38  ;;  %v480_v39 = vpop.f32.mrf.mxu0 }
  0xf6   : > { %v529_v40 = vpop.f32.mrf.mxu1  ;;  %v481_v41 = vadd.f32 %v480_v39, %v1653_v11 }
  0xf7   : > { %v530_v42 = vadd.f32 %v529_v40, %v1655_v12 }
  0xf8   : > { %v567_v47 = vmax.f32 %v481_v41, 0.0 }
  0xf9   : > { %v568_v49 = vmax.f32 %v530_v42, 0.0 }
  0xfd   : > { %v482_v43 = vpop.f32.mrf.mxu0 }
  0xfe   : > { %v483_v44 = vadd.f32 %v482_v43, %v1653_v11  ;;  %v531_v45 = vpop.f32.mrf.mxu1 }
  0xff   : > { %v532_v46 = vadd.f32 %v531_v45, %v1655_v12 }
 0x100   : > { %v569_v48 = vmax.f32 %v483_v44, 0.0 }
 0x101   : > { %v570_v50 = vmax.f32 %v532_v46, 0.0 }
 0x102   : > { %v595_v51 = vpack.c.bf16 %v569_v48, %v567_v47 }
 0x103   : > { %v596_v52 = vpack.c.bf16 %v570_v50, %v568_v49 }
 0x104   : > { %757 = vmatmul.bf16.gmra.mxu2 %v595_v51 }
 0x105   : > { %806 = vmatmul.bf16.gmra.mxu3 %v596_v52  ;;  %v485_v53 = vpop.f32.mrf.mxu0 }
 0x106   : > { %v534_v54 = vpop.f32.mrf.mxu1  ;;  %v486_v55 = vadd.f32 %v485_v53, %v1653_v11 }
 0x107   : > { %v535_v56 = vadd.f32 %v534_v54, %v1655_v12 }
 0x108   : > { %v571_v61 = vmax.f32 %v486_v55, 0.0 }
 0x109   : > { %v572_v63 = vmax.f32 %v535_v56, 0.0 }
 0x10d   : > { %v487_v57 = vpop.f32.mrf.mxu0 }
 0x10e   : > { %v488_v58 = vadd.f32 %v487_v57, %v1653_v11  ;;  %v536_v59 = vpop.f32.mrf.mxu1 }
 0x10f   : > { %v537_v60 = vadd.f32 %v536_v59, %v1655_v12 }
 0x110   : > { %v573_v62 = vmax.f32 %v488_v58, 0.0 }
 0x111   : > { %v574_v0 = vmax.f32 %v537_v60, 0.0 }
 0x112   : > { %v597_v1 = vpack.c.bf16 %v573_v62, %v571_v61  ;;  %v1692_v61 = vld [vmem:[%s1767_s4] ss:$0 sm:$0xff] }
 0x113   : > { %v598_v2 = vpack.c.bf16 %v574_v0, %v572_v63 }
 0x114   : > { %762 = vmatmul.bf16.gmra.mxu2 %v597_v1 }
 0x115   : > { %811 = vmatmul.bf16.gmra.mxu3 %v598_v2  ;;  %v490_v3 = vpop.f32.mrf.mxu0 }
 0x116   : > { %v539_v4 = vpop.f32.mrf.mxu1  ;;  %v491_v5 = vadd.f32 %v490_v3, %v1653_v11 }
 0x117   : > { %v540_v6 = vadd.f32 %v539_v4, %v1655_v12 }
 0x118   : > { %v575_v13 = vmax.f32 %v491_v5, 0.0 }
 0x119   : > { %v576_v15 = vmax.f32 %v540_v6, 0.0 }
 0x11d   : > { %v492_v7 = vpop.f32.mrf.mxu0 }
 0x11e   : > { %v493_v8 = vadd.f32 %v492_v7, %v1653_v11  ;;  %v541_v9 = vpop.f32.mrf.mxu1 }
 0x11f   : > { %v542_v10 = vadd.f32 %v541_v9, %v1655_v12 }
 0x120   : > { %v577_v14 = vmax.f32 %v493_v8, 0.0 }
 0x121   : > { %v578_v16 = vmax.f32 %v542_v10, 0.0 }
 0x122   : > { %v599_v17 = vpack.c.bf16 %v577_v14, %v575_v13 }
 0x123   : > { %v600_v18 = vpack.c.bf16 %v578_v16, %v576_v15 }
 0x124   : > { %767 = vmatmul.bf16.gmra.mxu2 %v599_v17 }
 0x125   : > { %816 = vmatmul.bf16.gmra.mxu3 %v600_v18  ;;  %v495_v19 = vpop.f32.mrf.mxu0 }
 0x126   : > { %v544_v20 = vpop.f32.mrf.mxu1  ;;  %v496_v21 = vadd.f32 %v495_v19, %v1653_v11 }
 0x127   : > { %v545_v22 = vadd.f32 %v544_v20, %v1655_v12 }
 0x128   : > { %v579_v27 = vmax.f32 %v496_v21, 0.0 }
 0x129   : > { %v580_v29 = vmax.f32 %v545_v22, 0.0 }
 0x12d   : > { %v497_v23 = vpop.f32.mrf.mxu0 }
 0x12e   : > { %v498_v24 = vadd.f32 %v497_v23, %v1653_v11  ;;  %v546_v25 = vpop.f32.mrf.mxu1 }
 0x12f   : > { %v547_v26 = vadd.f32 %v546_v25, %v1655_v12 }
 0x130   : > { %v581_v28 = vmax.f32 %v498_v24, 0.0 }
 0x131   : > { %v582_v30 = vmax.f32 %v547_v26, 0.0 }
 0x132   : > { %v601_v31 = vpack.c.bf16 %v581_v28, %v579_v27 }
 0x133   : > { %v602_v32 = vpack.c.bf16 %v582_v30, %v580_v29 }
 0x134   : > { %772 = vmatmul.bf16.gmra.mxu2 %v601_v31 }
 0x135   : > { %821 = vmatmul.bf16.gmra.mxu3 %v602_v32  ;;  %v500_v33 = vpop.f32.mrf.mxu0 }
 0x136   : > { %v549_v34 = vpop.f32.mrf.mxu1  ;;  %v501_v35 = vadd.f32 %v500_v33, %v1653_v11 }
 0x137   : > { %v550_v36 = vadd.f32 %v549_v34, %v1655_v12 }
 0x138   : > { %v583_v41 = vmax.f32 %v501_v35, 0.0 }
 0x139   : > { %v584_v43 = vmax.f32 %v550_v36, 0.0 }
 0x13d   : > { %v502_v37 = vpop.f32.mrf.mxu0 }
 0x13e   : > { %v503_v38 = vadd.f32 %v502_v37, %v1653_v11  ;;  %v551_v39 = vpop.f32.mrf.mxu1 }
 0x13f   : > { %v552_v40 = vadd.f32 %v551_v39, %v1655_v12 }
 0x140   : > { %v585_v42 = vmax.f32 %v503_v38, 0.0 }
 0x141   : > { %v586_v44 = vmax.f32 %v552_v40, 0.0 }
 0x142   : > { %v603_v45 = vpack.c.bf16 %v585_v42, %v583_v41 }
 0x143   : > { %v604_v46 = vpack.c.bf16 %v586_v44, %v584_v43 }
 0x144   : > { %777 = vmatmul.bf16.gmra.mxu2 %v603_v45 }
 0x145   : > { %826 = vmatmul.bf16.gmra.mxu3 %v604_v46  ;;  %v505_v47 = vpop.f32.mrf.mxu0 }
 0x146   : > { %v554_v48 = vpop.f32.mrf.mxu1  ;;  %v506_v49 = vadd.f32 %v505_v47, %v1653_v11 }
 0x147   : > { %v555_v50 = vadd.f32 %v554_v48, %v1655_v12 }
 0x148   : > { %v587_v55 = vmax.f32 %v506_v49, 0.0 }
 0x149   : > { %v588_v57 = vmax.f32 %v555_v50, 0.0 }
 0x14d   : > { %v507_v51 = vpop.f32.mrf.mxu0 }
 0x14e   : > { %v508_v52 = vadd.f32 %v507_v51, %v1653_v11  ;;  %v556_v53 = vpop.f32.mrf.mxu1 }
 0x14f   : > { %v557_v54 = vadd.f32 %v556_v53, %v1655_v12 }
 0x150   : > { %v589_v56 = vmax.f32 %v508_v52, 0.0 }
 0x151   : > { %v590_v58 = vmax.f32 %v557_v54, 0.0 }
 0x152   : > { %v605_v59 = vpack.c.bf16 %v589_v56, %v587_v55 }
 0x153   : > { %v606_v60 = vpack.c.bf16 %v590_v58, %v588_v57 }
 0x154   : > { %782 = vmatmul.bf16.gmra.mxu2 %v605_v59 }
 0x155   : > { %831 = vmatmul.bf16.gmra.mxu3 %v606_v60 }
 0x167   : > { %v748_v62 = vpop.f32.mrf.mxu2 }
 0x168   : > { %v749_v11 = vadd.f32 %v1692_v61, %v748_v62  ;;  %v797_v63 = vpop.f32.mrf.mxu3 }
 0x16a   : > { %v798_v0 = vadd.f32 %v797_v63, %v749_v11 }
 0x16c   : > { %837 = vst [vmem:[%s1696_s16] sm:$0xff] %v798_v0 }
 0x16f   : > { %v750_v12 = vpop.f32.mrf.mxu2 }
 0x170   : > { %v751_v1 = vadd.f32 %v1692_v61, %v750_v12  ;;  %v799_v2 = vpop.f32.mrf.mxu3 }
 0x172   : > { %v800_v3 = vadd.f32 %v799_v2, %v751_v1 }
 0x174   : > { %838 = vst [vmem:[%s1696_s16 + $0x8] sm:$0xff] %v800_v3 }
 0x177   : > { %v753_v4 = vpop.f32.mrf.mxu2 }
 0x178   : > { %v754_v5 = vadd.f32 %v1692_v61, %v753_v4  ;;  %v802_v6 = vpop.f32.mrf.mxu3 }
 0x17a   : > { %v803_v7 = vadd.f32 %v802_v6, %v754_v5 }
 0x17c   : > { %839 = vst [vmem:[%s1696_s16 + $0x10] sm:$0xff] %v803_v7 }
 0x17f   : > { %v755_v8 = vpop.f32.mrf.mxu2 }
 0x180   : > { %v756_v9 = vadd.f32 %v1692_v61, %v755_v8  ;;  %v804_v10 = vpop.f32.mrf.mxu3 }
 0x182   : > { %v805_v13 = vadd.f32 %v804_v10, %v756_v9 }
 0x184   : > { %840 = vst [vmem:[%s1696_s16 + $0x18] sm:$0xff] %v805_v13 }
 0x187   : > { %v758_v14 = vpop.f32.mrf.mxu2 }
 0x188   : > { %v759_v15 = vadd.f32 %v1692_v61, %v758_v14  ;;  %v807_v16 = vpop.f32.mrf.mxu3 }
 0x18a   : > { %v808_v17 = vadd.f32 %v807_v16, %v759_v15 }
 0x18c   : > { %841 = vst [vmem:[%s1696_s16 + $0x20] sm:$0xff] %v808_v17 }
 0x18f   : > { %v760_v18 = vpop.f32.mrf.mxu2 }
 0x190   : > { %v761_v19 = vadd.f32 %v1692_v61, %v760_v18  ;;  %v809_v20 = vpop.f32.mrf.mxu3 }
 0x192   : > { %v810_v21 = vadd.f32 %v809_v20, %v761_v19 }
 0x194   : > { %842 = vst [vmem:[%s1696_s16 + $0x28] sm:$0xff] %v810_v21 }
 0x197   : > { %v763_v22 = vpop.f32.mrf.mxu2 }
 0x198   : > { %v764_v23 = vadd.f32 %v1692_v61, %v763_v22  ;;  %v812_v24 = vpop.f32.mrf.mxu3 }
 0x19a   : > { %v813_v25 = vadd.f32 %v812_v24, %v764_v23 }
 0x19c   : > { %843 = vst [vmem:[%s1696_s16 + $0x30] sm:$0xff] %v813_v25 }
 0x19f   : > { %v765_v26 = vpop.f32.mrf.mxu2 }
 0x1a0   : > { %v766_v27 = vadd.f32 %v1692_v61, %v765_v26  ;;  %v814_v28 = vpop.f32.mrf.mxu3 }
 0x1a2   : > { %v815_v29 = vadd.f32 %v814_v28, %v766_v27 }
 0x1a4   : > { %844 = vst [vmem:[%s1696_s16 + $0x38] sm:$0xff] %v815_v29 }
 0x1a7   : > { %v768_v30 = vpop.f32.mrf.mxu2 }
 0x1a8   : > { %v769_v31 = vadd.f32 %v1692_v61, %v768_v30  ;;  %v817_v32 = vpop.f32.mrf.mxu3 }
 0x1aa   : > { %v818_v33 = vadd.f32 %v817_v32, %v769_v31 }
 0x1ac   : > { %845 = vst [vmem:[%s1696_s16 + $0x40] sm:$0xff] %v818_v33 }
 0x1af   : > { %v770_v34 = vpop.f32.mrf.mxu2 }
 0x1b0   : > { %v771_v35 = vadd.f32 %v1692_v61, %v770_v34  ;;  %v819_v36 = vpop.f32.mrf.mxu3 }
 0x1b2   : > { %v820_v37 = vadd.f32 %v819_v36, %v771_v35 }
 0x1b4   : > { %846 = vst [vmem:[%s1696_s16 + $0x48] sm:$0xff] %v820_v37 }
 0x1b7   : > { %v773_v38 = vpop.f32.mrf.mxu2 }
 0x1b8   : > { %v774_v39 = vadd.f32 %v1692_v61, %v773_v38  ;;  %v822_v40 = vpop.f32.mrf.mxu3 }
 0x1ba   : > { %v823_v41 = vadd.f32 %v822_v40, %v774_v39 }
 0x1bc   : > { %847 = vst [vmem:[%s1696_s16 + $0x50] sm:$0xff] %v823_v41 }
 0x1bf   : > { %v775_v42 = vpop.f32.mrf.mxu2 }
 0x1c0   : > { %v776_v43 = vadd.f32 %v1692_v61, %v775_v42  ;;  %v824_v44 = vpop.f32.mrf.mxu3 }
 0x1c2   : > { %v825_v45 = vadd.f32 %v824_v44, %v776_v43 }
 0x1c4   : > { %848 = vst [vmem:[%s1696_s16 + $0x58] sm:$0xff] %v825_v45 }
 0x1c7   : > { %v778_v46 = vpop.f32.mrf.mxu2 }
 0x1c8   : > { %v779_v47 = vadd.f32 %v1692_v61, %v778_v46  ;;  %v827_v48 = vpop.f32.mrf.mxu3 }
 0x1ca   : > { %v828_v49 = vadd.f32 %v827_v48, %v779_v47 }
 0x1cc   : > { %849 = vst [vmem:[%s1696_s16 + $0x60] sm:$0xff] %v828_v49 }
 0x1cf   : > { %v780_v50 = vpop.f32.mrf.mxu2 }
 0x1d0   : > { %v781_v51 = vadd.f32 %v1692_v61, %v780_v50  ;;  %v829_v52 = vpop.f32.mrf.mxu3 }
 0x1d2   : > { %v830_v53 = vadd.f32 %v829_v52, %v781_v51 }
 0x1d4   : > { %850 = vst [vmem:[%s1696_s16 + $0x68] sm:$0xff] %v830_v53 }
 0x1d7   : > { %v783_v54 = vpop.f32.mrf.mxu2 }
 0x1d8   : > { %v784_v55 = vadd.f32 %v1692_v61, %v783_v54  ;;  %v832_v56 = vpop.f32.mrf.mxu3 }
 0x1da   : > { %v833_v57 = vadd.f32 %v832_v56, %v784_v55 }
 0x1dc   : > { %851 = vst [vmem:[%s1696_s16 + $0x70] sm:$0xff] %v833_v57 }
 0x1df   : > { %v785_v58 = vpop.f32.mrf.mxu2 }
 0x1e0   : > { %v786_v59 = vadd.f32 %v1692_v61, %v785_v58  ;;  %v834_v60 = vpop.f32.mrf.mxu3 }
 0x1e2   : > { %v835_v62 = vadd.f32 %v834_v60, %v786_v59 }
 0x1e4   : > { %852 = vst [vmem:[%s1696_s16 + $0x78] sm:$0xff] %v835_v62 }
 0x1e5   : > { %1424 = shalt.err (!%p1421_p10)
}
 0x1e6   : > { %s1480_s17 = smov 128   ;;  %s1481_s28 = smov 8  }
 0x1e7   : > { %1207 = dma.vmem_to_hbm [thread:$0]  (%p1597_p3), %s867_s12, 2048, %s869_s14, %s854_s15, %s1480_s17, %s1480_s17, %s1481_s28  }
 0x1e8 PF: > { %s883_s16 = sand.u32 1, %s1459_s18   ;;  %p1777_p12 = scmp.ge.s32.totalorder %s1471_s21, 2 }
 0x1e9   : > { %s884_s23 = scalar_lea.sflag [#allocation4], %s883_s16 }
 0x1ea   : > { %p1224_p13 = pnand %p1777_p12, %p1547_p6 }
 0x1ec   : > { %p1225_p0 = pneg %p1224_p13 }
 0x1ee   : > { %1454 = dma.done.wait (%p1225_p0), %s884_s23, 2048  }
 0x1ef   : > { %1456 = vsyncadd (%p1225_p0), %s884_s23, 4294965248  ;;  %p20_p5 = scmp.ge.s32.totalorder %s1584_s30, 4   ;;  %s1778_s18 = smov %s1463_s19 }
 0x1f0   : > { %s1779_s19 = smov %s1467_s20  ;;  %s1780_s20 = smov %s1593_s9 }
 0x1f1   : > { %s1781_s21 = smov %s1584_s30  ;;  %22 = sbr.rel (!%p20_p5) target bundleno = 7 (0x7), region = 97 }
 0x1f6   :  { %890 = vsyncpa [#allocation3], 1 }
 0x1f7   :  { %892 = vsyncpa [#allocation3 + $0x1], 1 }
 0x1f8   :  { %893 = vsyncpa [#allocation6], 1 }
 0x1f9   :  { %894 = vsyncpa [#allocation9], 1 }
 0x1fa   :  { %895 = vsyncpa [#allocation4], 1 }
 0x1fb   :  { %897 = vsyncpa [#allocation4 + $0x1], 1 }

</bundles_post_ra>
